<compile_context>
chip_gen: v6e
topology: v6e:2x2x1
jax: 0.10.0
libtpu: 0.0.40
codegen_flags: <defaults>
</compile_context>

<pallas_src>
import jax
import jax.numpy as jnp
import numpy as np
from jax.experimental import pallas as pl
from jax.experimental.pallas import tpu as pltpu

HIDDEN = 32     # hidden_size (small synthetic stand-in for 1028)
OUTPUT = 48     # output_size (vocab size)
MAXLEN = 16     # max_length
BLK = 128       # lane-dense block width inside the packed weight/bias slabs
NBLK = 5        # number of 128-wide blocks in the slab


def attention_decoder_kernel(tok_ref, emb_ref, hid0_ref, enc_ref, w_ref, b_ref,
                             out_ref, hid_sc):
    H, L, V = HIDDEN, MAXLEN, OUTPUT
    del tok_ref  # token ids are consumed by the embedding-row index_map (scalar prefetch)

    t = pl.program_id(0)

    @pl.when(t == 0)
    def _():
        hid_sc[...] = hid0_ref[...]

    hidden = hid_sc[...]          # (1, H) — carried across decode steps in VMEM
    embedded = emb_ref[0]         # (1, H) — only the selected embedding row was DMA'd
    # dropout(p=0.1) is identity (eval / inference mode)
    # TODO(synk): stochastic dropout (training mode) not modeled.

    # --- merged MXU dot 1: [embedded | hidden] (1,2H) @ [block0 | block1] (2H,256) ---
    lhs = jnp.concatenate([embedded, hidden], axis=1)                       # (1, 2H)
    he = (jnp.dot(lhs, w_ref[:, 0:2 * BLK], preferred_element_type=jnp.float32)
          + b_ref[:, 0:2 * BLK])                                            # (1, 256)
    h_pack = he[:, 0:BLK]          # [h_r | h_z | h_n | attn_h-logits] at 0/32/64/96
    e_pack = he[:, BLK:2 * BLK]    # [comb_e + b_comb | ... | attn_e-logits] at 0/96

    # --- attention weights: softmax over L logits (lane-aligned add at offset 3H) ---
    attn_logits = h_pack[:, 3 * H:3 * H + L] + e_pack[:, 3 * H:3 * H + L]   # (1, L)
    m = jnp.max(attn_logits, axis=1, keepdims=True)
    e = jnp.exp(attn_logits - m)
    attn_w = e / jnp.sum(e, axis=1, keepdims=True)   # exact divide (not on the MXU path)

    # --- MXU dot 2: attn_applied = attn_weights @ encoder_outputs ---
    attn_applied = jnp.dot(attn_w, enc_ref[...],
                           preferred_element_type=jnp.float32)              # (1, H)

    # --- MXU dot 3: attn_combine (attn_applied part); relu ---
    a_pack = jnp.dot(attn_applied, w_ref[:H, 3 * BLK:4 * BLK],
                     preferred_element_type=jnp.float32)
    x = jnp.maximum(e_pack[:, 0:H] + a_pack[:, 0:H], 0.0)                   # (1, H)

    # --- MXU dot 4: GRU input gates (r,z,n lane-aligned with h_pack gates) ---
    gi = (jnp.dot(x, w_ref[:H, 2 * BLK:3 * BLK], preferred_element_type=jnp.float32)
          + b_ref[:, 2 * BLK:3 * BLK])
    r = jax.nn.sigmoid(gi[:, 0:H] + h_pack[:, 0:H])
    z = jax.nn.sigmoid(gi[:, H:2 * H] + h_pack[:, H:2 * H])
    n = jnp.tanh(gi[:, 2 * H:3 * H] + r * h_pack[:, 2 * H:3 * H])
    h_new = (1.0 - z) * n + z * hidden                                      # (1, H)

    # --- MXU dot 5: output projection + log_softmax ---
    o_pack = (jnp.dot(h_new, w_ref[:H, 4 * BLK:5 * BLK],
                      preferred_element_type=jnp.float32) + b_ref[:, 4 * BLK:5 * BLK])
    logits = o_pack[:, 0:V]
    mo = jnp.max(logits, axis=1, keepdims=True)
    s = logits - mo
    logp = s - jnp.log(jnp.sum(jnp.exp(s), axis=1, keepdims=True))          # (1, V)

    # carry hidden state to the next decode step
    hid_sc[...] = h_new

    # per-step output: three independent 128-lane blocks (no cross-piece lane shuffles)
    def lane_block(v):
        return jnp.concatenate([v, jnp.zeros((1, BLK - v.shape[1]), jnp.float32)], axis=1)

    packed = jnp.concatenate([lane_block(logp), lane_block(h_new), lane_block(attn_w)],
                             axis=1)                                        # (1, 384)
    out_ref[...] = packed.reshape(1, 1, 3 * BLK)


def pack_params(w_attn, b_attn, w_comb, b_comb, w_ih, b_ih, w_hh, b_hh, w_out, b_out):
    """Pack all weights into one (2H, 5*128) slab and all biases into one (1, 5*128) row.

    K-rows 0:H are the "embedded" rows, rows H:2H the "hidden" rows, so
    [embedded | hidden] @ slab[:, :256] fuses the hidden-side and embedded-side
    projections into a single MXU dot.  Gate / comb / attn lane offsets are aligned
    across blocks so the downstream adds need no cross-lane rotates.
    """
    H, L, V = HIDDEN, MAXLEN, OUTPUT
    K2 = 2 * H

    w_attn_e, w_attn_h = w_attn[:H], w_attn[H:]
    w_comb_e, w_comb_a = w_comb[:H], w_comb[H:]

    # block0 (hidden rows): [W_hr | W_hz | W_hn | W_attn_h] at lane 0/32/64/96
    blk0 = jnp.zeros((K2, BLK), jnp.float32)
    blk0 = blk0.at[H:, 0:3 * H].set(w_hh)
    blk0 = blk0.at[H:, 3 * H:3 * H + L].set(w_attn_h)
    # block1 (embedded rows): [W_comb_e | ... | W_attn_e] at lane 0 / 96
    blk1 = jnp.zeros((K2, BLK), jnp.float32)
    blk1 = blk1.at[:H, 0:H].set(w_comb_e)
    blk1 = blk1.at[:H, 3 * H:3 * H + L].set(w_attn_e)
    # block2: GRU input gates [W_ir | W_iz | W_in] at lane 0/32/64
    blk2 = jnp.zeros((K2, BLK), jnp.float32).at[:H, 0:3 * H].set(w_ih)
    # block3: [W_comb_a] at lane 0 (aligned with W_comb_e in block1)
    blk3 = jnp.zeros((K2, BLK), jnp.float32).at[:H, 0:H].set(w_comb_a)
    # block4: [W_out] at lane 0
    blk4 = jnp.zeros((K2, BLK), jnp.float32).at[:H, 0:V].set(w_out)

    w_slab = jnp.concatenate([blk0, blk1, blk2, blk3, blk4], axis=1)        # (2H, 640)

    b0 = jnp.zeros((1, BLK), jnp.float32).at[:, 0:3 * H].set(b_hh)
    b0 = b0.at[:, 3 * H:3 * H + L].set(b_attn)
    b1 = jnp.zeros((1, BLK), jnp.float32).at[:, 0:H].set(b_comb)
    b2 = jnp.zeros((1, BLK), jnp.float32).at[:, 0:3 * H].set(b_ih)
    b3 = jnp.zeros((1, BLK), jnp.float32)
    b4 = jnp.zeros((1, BLK), jnp.float32).at[:, 0:V].set(b_out)
    b_slab = jnp.concatenate([b0, b1, b2, b3, b4], axis=1)                  # (1, 640)

    return w_slab.astype(jnp.float32), b_slab.astype(jnp.float32)


def attention_decoder(toks, emb, hidden, encoder_outputs, w_slab, b_slab):
    """Run T teacher-forced decode steps in ONE pallas_call.

    toks: (T,) int32; emb: (V,H); hidden: (1,1,H); encoder_outputs: (L,H).
    Returns (logp_seq (T,V), hidden_seq (T,H), attn_seq (T,L)).
    """
    H, L, V = HIDDEN, MAXLEN, OUTPUT
    T = toks.shape[0]
    vocab = emb.shape[0]
    emb3d = emb.reshape(vocab, 1, H)   # so the (1,1,H) row-block equals full trailing dims
    hidden2d = hidden.reshape(1, H)

    grid_spec = pltpu.PrefetchScalarGridSpec(
        num_scalar_prefetch=1,          # token sequence lands in SMEM, drives emb index_map
        grid=(T,),
        in_specs=[
            # only the selected embedding row is DMA'd HBM->VMEM at each step
            pl.BlockSpec((1, 1, H), lambda t, tok: (tok[t], 0, 0)),
            pl.BlockSpec((1, H), lambda t, tok: (0, 0)),             # initial hidden
            pl.BlockSpec((L, H), lambda t, tok: (0, 0)),             # encoder outputs (resident)
            pl.BlockSpec((2 * H, NBLK * BLK), lambda t, tok: (0, 0)),  # weight slab (resident)
            pl.BlockSpec((1, NBLK * BLK), lambda t, tok: (0, 0)),      # bias slab (resident)
        ],
        out_specs=pl.BlockSpec((1, 1, 3 * BLK), lambda t, tok: (t, 0, 0)),
        scratch_shapes=[pltpu.VMEM((1, H), jnp.float32)],              # hidden carry
    )

    # 5 MXU dots per step: merged (1,2H)@(2H,256), attn (1,L)@(L,H), 3x (1,H)@(H,128)
    flops = T * 2 * (2 * H * 2 * BLK + L * H + 3 * H * BLK)
    bytes_accessed = 4 * (2 * H * NBLK * BLK + NBLK * BLK + L * H + H
                          + T * (H + 3 * BLK))

    packed = pl.pallas_call(
        attention_decoder_kernel,
        out_shape=jax.ShapeDtypeStruct((T, 1, 3 * BLK), jnp.float32),
        grid_spec=grid_spec,
        compiler_params=pltpu.CompilerParams(dimension_semantics=("arbitrary",)),
        cost_estimate=pl.CostEstimate(flops=flops,
                                      transcendentals=T * (L + V + 4 * H),
                                      bytes_accessed=bytes_accessed),
    )(toks.astype(jnp.int32), emb3d, hidden2d, encoder_outputs, w_slab, b_slab)

    packed = packed.reshape(T, 3 * BLK)
    logp_seq = packed[:, 0:V]
    hidden_seq = packed[:, BLK:BLK + H]
    attn_seq = packed[:, 2 * BLK:2 * BLK + L]
    return logp_seq, hidden_seq, attn_seq


def reference_forward(tok, emb, hidden, enc, w_attn, b_attn, w_comb, b_comb,
                      w_ih, b_ih, w_hh, b_hh, w_out, b_out):
    """Pure-JAX single-step reference mirroring the PyTorch forward exactly."""
    H = HIDDEN
    hidden2d = hidden.reshape(1, H)
    embedded = emb[tok[0]][None, :]
    cat1 = jnp.concatenate([embedded, hidden2d], axis=1)
    attn_w = jax.nn.softmax(cat1 @ w_attn + b_attn, axis=1)
    applied = attn_w @ enc
    x = jnp.maximum(jnp.concatenate([embedded, applied], axis=1) @ w_comb + b_comb, 0.0)
    gi = x @ w_ih + b_ih
    gh = hidden2d @ w_hh + b_hh
    r = jax.nn.sigmoid(gi[:, :H] + gh[:, :H])
    z = jax.nn.sigmoid(gi[:, H:2 * H] + gh[:, H:2 * H])
    n = jnp.tanh(gi[:, 2 * H:] + r * gh[:, 2 * H:])
    h_new = (1.0 - z) * n + z * hidden2d
    logp = jax.nn.log_softmax(h_new @ w_out + b_out, axis=1)
    return logp, h_new.reshape(1, 1, H), attn_w


if __name__ == "__main__":
    H, L, V = HIDDEN, MAXLEN, OUTPUT
    key = jax.random.PRNGKey(0)
    ks = jax.random.split(key, 16)

    def init(k, shape, scale=0.1):
        return (scale * jax.random.normal(k, shape)).astype(jnp.float32)

    # Parameters (deterministic, synthetic), stored pre-transposed as (in, out).
    emb_table = init(ks[0], (V, H))
    w_attn = init(ks[1], (2 * H, L)); b_attn = init(ks[2], (1, L))
    w_comb = init(ks[3], (2 * H, H)); b_comb = init(ks[4], (1, H))
    w_ih = init(ks[5], (H, 3 * H));   b_ih = init(ks[6], (1, 3 * H))
    w_hh = init(ks[7], (H, 3 * H));   b_hh = init(ks[8], (1, 3 * H))
    w_out = init(ks[9], (H, V));      b_out = init(ks[10], (1, V))

    # Inputs: T=4 teacher-forced decode steps in a single kernel launch.
    toks = jnp.array([5, 2, 9, 1], dtype=jnp.int32)
    hidden0 = init(ks[11], (1, 1, H))                # previous hidden state
    encoder_outputs = init(ks[12], (L, H))           # (max_length, hidden)

    # Offline packing of weights/biases into the lane-dense slabs the kernel consumes.
    w_slab, b_slab = pack_params(w_attn, b_attn, w_comb, b_comb,
                                 w_ih, b_ih, w_hh, b_hh, w_out, b_out)

    logp_seq, hidden_seq, attn_seq = attention_decoder(
        toks, emb_table, hidden0, encoder_outputs, w_slab, b_slab)
    jax.block_until_ready((logp_seq, hidden_seq, attn_seq))

    # Step-by-step pure-JAX reference (hidden threaded through between steps).
    hid = hidden0
    for t in range(int(toks.shape[0])):
        ref_logp, hid, ref_attn = reference_forward(
            toks[t:t + 1], emb_table, hid, encoder_outputs,
            w_attn, b_attn, w_comb, b_comb, w_ih, b_ih, w_hh, b_hh, w_out, b_out)
        np.testing.assert_allclose(np.asarray(logp_seq[t]), np.asarray(ref_logp[0]),
                                   rtol=1e-3, atol=1e-4)
        np.testing.assert_allclose(np.asarray(hidden_seq[t]), np.asarray(hid.reshape(H)),
                                   rtol=1e-3, atol=1e-4)
        np.testing.assert_allclose(np.asarray(attn_seq[t]), np.asarray(ref_attn[0]),
                                   rtol=1e-3, atol=1e-4)

    T = toks.shape[0]
    assert logp_seq.shape == (T, V) and hidden_seq.shape == (T, H) and attn_seq.shape == (T, L)
    print("KERNEL_OK")
</pallas_src>

<mosaic_0001>
module attributes {stable_mosaic.version = 11 : i64} {
  func.func @attention_decoder_kernel(%arg0: i32, %arg1: memref<4xi32, #tpu.memory_space<smem>>, %arg2: memref<1x1x32xf32, #tpu.memory_space<vmem>>, %arg3: memref<1x32xf32, #tpu.memory_space<vmem>>, %arg4: memref<16x32xf32, #tpu.memory_space<vmem>>, %arg5: memref<64x640xf32, #tpu.memory_space<vmem>>, %arg6: memref<1x640xf32, #tpu.memory_space<vmem>>, %arg7: memref<1x1x384xf32, #tpu.memory_space<vmem>>, %arg8: memref<1x32xf32, #tpu.memory_space<vmem>>) attributes {dimension_semantics = [#tpu.dimension_semantics<arbitrary>], iteration_bounds = array<i64: 4>, scalar_prefetch = 1 : i64, scratch_operands = 1 : i64, tpu.core_type = #tpu.core_type<tc>, window_params = [{transform_indices = @transform_0, window_bounds = array<i64: 1, 1, 32>}, {pipeline_mode = #tpu.pipeline_mode<synchronous>, transform_indices = @transform_1, window_bounds = array<i64: 1, 32>}, {pipeline_mode = #tpu.pipeline_mode<synchronous>, transform_indices = @transform_2, window_bounds = array<i64: 16, 32>}, {pipeline_mode = #tpu.pipeline_mode<synchronous>, transform_indices = @transform_3, window_bounds = array<i64: 64, 640>}, {pipeline_mode = #tpu.pipeline_mode<synchronous>, transform_indices = @transform_4, window_bounds = array<i64: 1, 640>}, {transform_indices = @transform_5, window_bounds = array<i64: 1, 1, 384>}]} {
    %c0_i32 = arith.constant 0 : i32
    %0 = arith.cmpi eq, %arg0, %c0_i32 : i32
    %1 = arith.extui %0 : i1 to i32
    %c0_i32_0 = arith.constant 0 : i32
    %2 = arith.cmpi ne, %1, %c0_i32_0 : i32
    scf.if %2 {
      %c0_38 = arith.constant 0 : index
      %c0_39 = arith.constant 0 : index
      %89 = vector.load %arg3[%c0_38, %c0_39] : memref<1x32xf32, #tpu.memory_space<vmem>>, vector<1x32xf32>
      %c0_40 = arith.constant 0 : index
      %c0_41 = arith.constant 0 : index
      %90 = vector.load %arg8[%c0_40, %c0_41] : memref<1x32xf32, #tpu.memory_space<vmem>>, vector<1x32xf32>
      tpu.vector_store %arg8[%c0_40, %c0_41], %89 {strides = array<i32>} : memref<1x32xf32, #tpu.memory_space<vmem>>, vector<1x32xf32>,
    } else {
    }
    %c0 = arith.constant 0 : index
    %c0_1 = arith.constant 0 : index
    %3 = vector.load %arg8[%c0, %c0_1] : memref<1x32xf32, #tpu.memory_space<vmem>>, vector<1x32xf32>
    %c0_2 = arith.constant 0 : index
    %c0_3 = arith.constant 0 : index
    %c0_4 = arith.constant 0 : index
    %4 = vector.load %arg2[%c0_2, %c0_3, %c0_4] : memref<1x1x32xf32, #tpu.memory_space<vmem>>, vector<1x1x32xf32>
    %5 = vector.shape_cast %4 : vector<1x1x32xf32> to vector<1x32xf32>
    %6 = tpu.concatenate %5, %3 in 1 : vector<1x32xf32>, vector<1x32xf32> -> vector<1x64xf32>
    %c0_5 = arith.constant 0 : index
    %c0_6 = arith.constant 0 : index
    %7 = vector.load %arg5[%c0_5, %c0_6] : memref<64x640xf32, #tpu.memory_space<vmem>>, vector<64x256xf32>
    %cst = arith.constant dense<0.000000e+00> : vector<1x256xf32>
    %8 = tpu.matmul %6, %7, %cst {dimension_numbers = #tpu.dot_dimension_numbers<[1], [0], [0], [1], [0, 0, 1, 1], [], []>} : vector<1x64xf32>, vector<64x256xf32>, vector<1x256xf32> -> vector<1x256xf32>
    %c0_7 = arith.constant 0 : index
    %c0_8 = arith.constant 0 : index
    %9 = vector.load %arg6[%c0_7, %c0_8] : memref<1x640xf32, #tpu.memory_space<vmem>>, vector<1x256xf32>
    %10 = arith.addf %8, %9 : vector<1x256xf32>
    %11 = vector.extract_strided_slice %10 {offsets = [0, 0], sizes = [1, 128], strides = [1, 1]} : vector<1x256xf32> to vector<1x128xf32>
    %12 = vector.extract_strided_slice %10 {offsets = [0, 128], sizes = [1, 128], strides = [1, 1]} : vector<1x256xf32> to vector<1x128xf32>
    %13 = vector.extract_strided_slice %11 {offsets = [0, 96], sizes = [1, 16], strides = [1, 1]} : vector<1x128xf32> to vector<1x16xf32>
    %14 = vector.extract_strided_slice %12 {offsets = [0, 96], sizes = [1, 16], strides = [1, 1]} : vector<1x128xf32> to vector<1x16xf32>
    %15 = arith.addf %13, %14 : vector<1x16xf32>
    %cst_9 = arith.constant dense<0xFF800000> : vector<1xf32>
    %16 = vector.multi_reduction <maximumf>, %15, %cst_9 [1] : vector<1x16xf32> to vector<1xf32>
    %17 = vector.shape_cast %16 : vector<1xf32> to vector<1x1xf32>
    %18 = vector.broadcast %17 : vector<1x1xf32> to vector<1x16xf32>
    %19 = arith.subf %15, %18 : vector<1x16xf32>
    %20 = math.exp %19 : vector<1x16xf32>
    %cst_10 = arith.constant dense<0.000000e+00> : vector<1xf32>
    %21 = vector.multi_reduction <add>, %20, %cst_10 [1] : vector<1x16xf32> to vector<1xf32>
    %22 = vector.shape_cast %21 : vector<1xf32> to vector<1x1xf32>
    %23 = vector.broadcast %22 : vector<1x1xf32> to vector<1x16xf32>
    %24 = arith.divf %20, %23 : vector<1x16xf32>
    %c0_11 = arith.constant 0 : index
    %c0_12 = arith.constant 0 : index
    %25 = vector.load %arg4[%c0_11, %c0_12] : memref<16x32xf32, #tpu.memory_space<vmem>>, vector<16x32xf32>
    %cst_13 = arith.constant dense<0.000000e+00> : vector<1x32xf32>
    %26 = tpu.matmul %24, %25, %cst_13 {dimension_numbers = #tpu.dot_dimension_numbers<[1], [0], [0], [1], [0, 0, 1, 1], [], []>} : vector<1x16xf32>, vector<16x32xf32>, vector<1x32xf32> -> vector<1x32xf32>
    %c0_14 = arith.constant 0 : index
    %c384 = arith.constant 384 : index
    %27 = vector.load %arg5[%c0_14, %c384] : memref<64x640xf32, #tpu.memory_space<vmem>>, vector<32x128xf32>
    %cst_15 = arith.constant dense<0.000000e+00> : vector<1x128xf32>
    %28 = tpu.matmul %26, %27, %cst_15 {dimension_numbers = #tpu.dot_dimension_numbers<[1], [0], [0], [1], [0, 0, 1, 1], [], []>} : vector<1x32xf32>, vector<32x128xf32>, vector<1x128xf32> -> vector<1x128xf32>
    %29 = vector.extract_strided_slice %12 {offsets = [0, 0], sizes = [1, 32], strides = [1, 1]} : vector<1x128xf32> to vector<1x32xf32>
    %30 = vector.extract_strided_slice %28 {offsets = [0, 0], sizes = [1, 32], strides = [1, 1]} : vector<1x128xf32> to vector<1x32xf32>
    %31 = arith.addf %29, %30 : vector<1x32xf32>
    %cst_16 = arith.constant 0.000000e+00 : f32
    %32 = vector.broadcast %cst_16 : f32 to vector<1x32xf32>
    %33 = arith.maximumf %31, %32 : vector<1x32xf32>
    %c0_17 = arith.constant 0 : index
    %c256 = arith.constant 256 : index
    %34 = vector.load %arg5[%c0_17, %c256] : memref<64x640xf32, #tpu.memory_space<vmem>>, vector<32x128xf32>
    %cst_18 = arith.constant dense<0.000000e+00> : vector<1x128xf32>
    %35 = tpu.matmul %33, %34, %cst_18 {dimension_numbers = #tpu.dot_dimension_numbers<[1], [0], [0], [1], [0, 0, 1, 1], [], []>} : vector<1x32xf32>, vector<32x128xf32>, vector<1x128xf32> -> vector<1x128xf32>
    %c0_19 = arith.constant 0 : index
    %c256_20 = arith.constant 256 : index
    %36 = vector.load %arg6[%c0_19, %c256_20] : memref<1x640xf32, #tpu.memory_space<vmem>>, vector<1x128xf32>
    %37 = arith.addf %35, %36 : vector<1x128xf32>
    %38 = vector.extract_strided_slice %37 {offsets = [0, 0], sizes = [1, 32], strides = [1, 1]} : vector<1x128xf32> to vector<1x32xf32>
    %39 = vector.extract_strided_slice %11 {offsets = [0, 0], sizes = [1, 32], strides = [1, 1]} : vector<1x128xf32> to vector<1x32xf32>
    %40 = arith.addf %38, %39 : vector<1x32xf32>
    %41 = arith.negf %40 : vector<1x32xf32>
    %42 = math.exp %41 : vector<1x32xf32>
    %cst_21 = arith.constant 1.000000e+00 : f32
    %43 = vector.broadcast %cst_21 : f32 to vector<1x32xf32>
    %44 = arith.addf %43, %42 : vector<1x32xf32>
    %45 = arith.divf %43, %44 : vector<1x32xf32>
    %46 = vector.extract_strided_slice %37 {offsets = [0, 32], sizes = [1, 32], strides = [1, 1]} : vector<1x128xf32> to vector<1x32xf32>
    %47 = vector.extract_strided_slice %11 {offsets = [0, 32], sizes = [1, 32], strides = [1, 1]} : vector<1x128xf32> to vector<1x32xf32>
    %48 = arith.addf %46, %47 : vector<1x32xf32>
    %49 = arith.negf %48 : vector<1x32xf32>
    %50 = math.exp %49 : vector<1x32xf32>
    %cst_22 = arith.constant 1.000000e+00 : f32
    %51 = vector.broadcast %cst_22 : f32 to vector<1x32xf32>
    %52 = arith.addf %51, %50 : vector<1x32xf32>
    %53 = arith.divf %51, %52 : vector<1x32xf32>
    %54 = vector.extract_strided_slice %37 {offsets = [0, 64], sizes = [1, 32], strides = [1, 1]} : vector<1x128xf32> to vector<1x32xf32>
    %55 = vector.extract_strided_slice %11 {offsets = [0, 64], sizes = [1, 32], strides = [1, 1]} : vector<1x128xf32> to vector<1x32xf32>
    %56 = arith.mulf %45, %55 : vector<1x32xf32>
    %57 = arith.addf %54, %56 : vector<1x32xf32>
    %58 = math.tanh %57 : vector<1x32xf32>
    %cst_23 = arith.constant 1.000000e+00 : f32
    %59 = vector.broadcast %cst_23 : f32 to vector<1x32xf32>
    %60 = arith.subf %59, %53 : vector<1x32xf32>
    %61 = arith.mulf %60, %58 : vector<1x32xf32>
    %62 = arith.mulf %53, %3 : vector<1x32xf32>
    %63 = arith.addf %61, %62 : vector<1x32xf32>
    %c0_24 = arith.constant 0 : index
    %c512 = arith.constant 512 : index
    %64 = vector.load %arg5[%c0_24, %c512] : memref<64x640xf32, #tpu.memory_space<vmem>>, vector<32x128xf32>
    %cst_25 = arith.constant dense<0.000000e+00> : vector<1x128xf32>
    %65 = tpu.matmul %63, %64, %cst_25 {dimension_numbers = #tpu.dot_dimension_numbers<[1], [0], [0], [1], [0, 0, 1, 1], [], []>} : vector<1x32xf32>, vector<32x128xf32>, vector<1x128xf32> -> vector<1x128xf32>
    %c0_26 = arith.constant 0 : index
    %c512_27 = arith.constant 512 : index
    %66 = vector.load %arg6[%c0_26, %c512_27] : memref<1x640xf32, #tpu.memory_space<vmem>>, vector<1x128xf32>
    %67 = arith.addf %65, %66 : vector<1x128xf32>
    %68 = vector.extract_strided_slice %67 {offsets = [0, 0], sizes = [1, 48], strides = [1, 1]} : vector<1x128xf32> to vector<1x48xf32>
    %cst_28 = arith.constant dense<0xFF800000> : vector<1xf32>
    %69 = vector.multi_reduction <maximumf>, %68, %cst_28 [1] : vector<1x48xf32> to vector<1xf32>
    %70 = vector.shape_cast %69 : vector<1xf32> to vector<1x1xf32>
    %71 = vector.broadcast %70 : vector<1x1xf32> to vector<1x48xf32>
    %72 = arith.subf %68, %71 : vector<1x48xf32>
    %73 = math.exp %72 : vector<1x48xf32>
    %cst_29 = arith.constant dense<0.000000e+00> : vector<1xf32>
    %74 = vector.multi_reduction <add>, %73, %cst_29 [1] : vector<1x48xf32> to vector<1xf32>
    %75 = vector.shape_cast %74 : vector<1xf32> to vector<1x1xf32>
    %76 = math.log %75 : vector<1x1xf32>
    %77 = vector.broadcast %76 : vector<1x1xf32> to vector<1x48xf32>
    %78 = arith.subf %72, %77 : vector<1x48xf32>
    %c0_30 = arith.constant 0 : index
    %c0_31 = arith.constant 0 : index
    %79 = vector.load %arg8[%c0_30, %c0_31] : memref<1x32xf32, #tpu.memory_space<vmem>>, vector<1x32xf32>
    tpu.vector_store %arg8[%c0_30, %c0_31], %63 {strides = array<i32>} : memref<1x32xf32, #tpu.memory_space<vmem>>, vector<1x32xf32>,
    %cst_32 = arith.constant 0.000000e+00 : f32
    %80 = vector.broadcast %cst_32 : f32 to vector<1x80xf32>
    %81 = tpu.concatenate %78, %80 in 1 : vector<1x48xf32>, vector<1x80xf32> -> vector<1x128xf32>
    %cst_33 = arith.constant 0.000000e+00 : f32
    %82 = vector.broadcast %cst_33 : f32 to vector<1x96xf32>
    %83 = tpu.concatenate %63, %82 in 1 : vector<1x32xf32>, vector<1x96xf32> -> vector<1x128xf32>
    %cst_34 = arith.constant 0.000000e+00 : f32
    %84 = vector.broadcast %cst_34 : f32 to vector<1x112xf32>
    %85 = tpu.concatenate %24, %84 in 1 : vector<1x16xf32>, vector<1x112xf32> -> vector<1x128xf32>
    %86 = tpu.concatenate %81, %83, %85 in 1 : vector<1x128xf32>, vector<1x128xf32>, vector<1x128xf32> -> vector<1x384xf32>
    %87 = vector.shape_cast %86 : vector<1x384xf32> to vector<1x1x384xf32>
    %c0_35 = arith.constant 0 : index
    %c0_36 = arith.constant 0 : index
    %c0_37 = arith.constant 0 : index
    %88 = vector.load %arg7[%c0_35, %c0_36, %c0_37] : memref<1x1x384xf32, #tpu.memory_space<vmem>>, vector<1x1x384xf32>
    tpu.vector_store %arg7[%c0_35, %c0_36, %c0_37], %87 {strides = array<i32>} : memref<1x1x384xf32, #tpu.memory_space<vmem>>, vector<1x1x384xf32>,
    return
  }
  func.func @transform_0(%arg0: i32, %arg1: memref<4xi32, #tpu.memory_space<smem>>) -> (i32, i32, i32) {
    %0 = arith.index_cast %arg0 : i32 to index
    %1 = memref.load %arg1[%0] : memref<4xi32, #tpu.memory_space<smem>>
    %c0_i32 = arith.constant 0 : i32
    %c0_i32_0 = arith.constant 0 : i32
    %c0_i32_1 = arith.constant 0 : i32
    return %1, %c0_i32, %c0_i32_0 : i32, i32, i32
  }
  func.func @transform_1(%arg0: i32, %arg1: memref<4xi32, #tpu.memory_space<smem>>) -> (i32, i32) {
    %c0_i32 = arith.constant 0 : i32
    %c0_i32_0 = arith.constant 0 : i32
    %c0_i32_1 = arith.constant 0 : i32
    return %c0_i32, %c0_i32_0 : i32, i32
  }
  func.func @transform_2(%arg0: i32, %arg1: memref<4xi32, #tpu.memory_space<smem>>) -> (i32, i32) {
    %c0_i32 = arith.constant 0 : i32
    %c0_i32_0 = arith.constant 0 : i32
    %c0_i32_1 = arith.constant 0 : i32
    return %c0_i32, %c0_i32_0 : i32, i32
  }
  func.func @transform_3(%arg0: i32, %arg1: memref<4xi32, #tpu.memory_space<smem>>) -> (i32, i32) {
    %c0_i32 = arith.constant 0 : i32
    %c0_i32_0 = arith.constant 0 : i32
    %c0_i32_1 = arith.constant 0 : i32
    return %c0_i32, %c0_i32_0 : i32, i32
  }
  func.func @transform_4(%arg0: i32, %arg1: memref<4xi32, #tpu.memory_space<smem>>) -> (i32, i32) {
    %c0_i32 = arith.constant 0 : i32
    %c0_i32_0 = arith.constant 0 : i32
    %c0_i32_1 = arith.constant 0 : i32
    return %c0_i32, %c0_i32_0 : i32, i32
  }
  func.func @transform_5(%arg0: i32, %arg1: memref<4xi32, #tpu.memory_space<smem>>) -> (i32, i32, i32) {
    %c0_i32 = arith.constant 0 : i32
    %c0_i32_0 = arith.constant 0 : i32
    %c0_i32_1 = arith.constant 0 : i32
    return %arg0, %c0_i32, %c0_i32_0 : i32, i32, i32
  }
}

</mosaic_0001>

<bundles_post_ra>
// kernel: tpu_custom_call.1
= control target key start
LH: loop header
LB: loop body
LE: loop exit
PB: predicated region body
PF: predicated region fallthrough
CT: control target
= control target key end

     0   :  { %s1371_s0 = inlined_call_operand.vmem [shape: s32[4], index: 0, kind: input, shape index: {}]   ;;  %s1372_s1 = inlined_call_operand.vmem [shape: f32[48,1,32], index: 1, kind: input, shape index: {}]   ;;  %s1373_s2 = inlined_call_operand.vmem [shape: f32[1,32], index: 2, kind: input, shape index: {}]   ;;  %s1374_s3 = inlined_call_operand.vmem [shape: f32[16,32], index: 3, kind: input, shape index: {}]   ;;  %s1375_s4 = inlined_call_operand.hbm [shape: f32[64,640], index: 4, kind: input, shape index: {}]   ;;  %s1376_s5 = inlined_call_operand.vmem [shape: f32[1,640], index: 5, kind: input, shape index: {}]   ;;  %s1377_s6 = inlined_call_operand.hbm [shape: f32[4,1,384], index: 6, kind: output, shape index: {}]  }
   0x1   :  { %s11_s23 = sshll.u32 %s1371_s0, 4  ;;  %s12_s23 = int_to_ptr.vmem [resolvable:$true] %s11_s23 }
   0x2   :  { %s1013_s24 = scalar_lea.vmem %s12_s23, 16  ;;  %p1018_p1 = scmp.lt.s32.totalorder %s12_s23, %s12_s23 }
   0x3   :  { %p1014_p0 = scmp.ne.s32.totalorder %s12_s23, %s1013_s24  ;;  %p1019_p2 = scmp.lt.s32.totalorder %s1013_s24, %s1013_s24 }
   0x5   :  { %p1020_p3 = por %p1019_p2, %p1018_p1 }
   0x7   :  { %p1021_p4 = pnand %p1020_p3, %p1014_p0 }
   0x9   :  { %1024 = shalt.err (!%p1021_p4)  }
   0xa   :  { %s1119_s25 = smov [#allocation4]  }
   0xb   :  { %14 = dma.vmem_to_smem %s12_s23, 16, %s1119_s25, [#allocation3] }
   0xc   :  { %1093 = dma.done.wait [#allocation3], 16 }
   0xd   :  { %1094 = vsyncadd [#allocation3], 4294967280 }
   0xe   :  { %16 = sfence }
   0xf   :  { %17 = vsyncpa [#allocation6], 0 }
  0x10   :  { %18 = vsyncpa [#allocation7], 0 }
  0x11   :  { %20 = vsyncpa [#allocation7 + $0x1], 0  ;;  %s1168_s26 = smov 0   ;;  %s1170_s27 = smov 0  }
  0x12   :  { %s1172_s0 = smov 0   ;;  %s1174_s28 = smov 0  }
  0x13 LB: > { %s1189_s29 = sadd.s32 4294967295, %s1117_s28   ;;  %s863_s30 = sadd.s32 4294967294, %s1117_s28   ;;  %s1117_s28 = sphi %s1174_s28, %s1386_s28   ;;  %s1113_s0 = sphi %s1172_s0, %s1385_s0   ;;  %s1109_s27 = sphi %s1170_s27, %s1384_s27   ;;  %s1105_s26 = sphi %s1168_s26, %s1383_s26  }
  0x14   : > { %s1193_s7 = sadd.s32 1, %s1117_s28   ;;  %s145_s8 = sadd.s32 1, %s1113_s0 }
  0x15   : > { %s142_s9 = ssub.s32 %s1117_s28, %s1193_s7  ;;  %p155_p5 = scmp.ne.s32.totalorder %s1113_s0, %s1109_s27 }
  0x16   : > { %p143_p6 = scmp.eq.s32.totalorder %s142_s9, 0  ;;  %p156_p7 = scmp.eq.s32.totalorder %s1189_s29, 3 }
  0x17   : > { %p161_p8 = scmp.ne.s32.totalorder %s1109_s27, %s1105_s26  ;;  %p162_p9 = scmp.eq.s32.totalorder %s863_s30, 3 }
  0x18   : > { %s1204_s10 = scalar_select %p143_p6, %s1113_s0, %s145_s8  }
  0x19   : > { %p1206_p10 = por %p156_p7, %p155_p5  ;;  %p1210_p11 = por %p162_p9, %p161_p8 }
  0x1a   : > { %p864_p12 = scmp.ge.s32.totalorder %s1117_s28, 1  ;;  %p169_p13 = scmp.lt.s32.totalorder %s1117_s28, 5 }
  0x1b   : > { %s1379_s12 = scalar_select %p1210_p11, 1, 0 }
  0x1c   : > { %p954_p1 = scmp.eq.s32.totalorder %s1189_s29, 0  ;;  %p1218_p2 = pnand %p864_p12, %p169_p13 }
  0x1d   : > { %s1120_s14 = smov [#allocation5]  }
  0x1e   : > { %s187_s15 = sshll.u32 %s1120_s14, 4  ;;  %p946_p3 = pneg %p1218_p2  ;;  %s188_s15 = int_to_ptr.vmem [resolvable:$true] %s187_s15 }
  0x1f   : > { %s1036_s16 = scalar_lea.vmem %s188_s15, 5120  ;;  %p1044_p9 = scmp.lt.s32.totalorder %s188_s15, %s188_s15 }
  0x20   : > { %p947_p4 = pnand %p954_p1, %p946_p3  ;;  %p1037_p6 = scmp.ne.s32.totalorder %s188_s15, %s1036_s16 }
  0x21   : > { %p1045_p0 = scmp.lt.s32.totalorder %s1036_s16, %s1036_s16 }
  0x22   : > { %p1027_p5 = pneg %p947_p4 }
  0x23   : > { %p1046_p11 = por %p1045_p0, %p1044_p9 }
  0x24   : > { %p1039_p7 = pnand %p1037_p6, %p1027_p5 }
  0x26   : > { %p1040_p8 = pneg %p1039_p7 }
  0x28   : > { %p1047_p12 = pnand %p1046_p11, %p1040_p8 }
  0x2a   : > { %1050 = shalt.err (!%p1047_p12)
}
  0x2b   : > { %s1121_s17 = smov 640   ;;  %s1122_s18 = smov 40  }
  0x2c   : > { %949 = dma.hbm_to_vmem [thread:$0]  (!%p947_p4), %s1375_s4, 5120, %s188_s15, [#allocation6], %s1121_s17, %s1121_s17, %s1122_s18  }
  0x2d   : > { %214 = sbr.rel (%p1218_p2) target bundleno = 2444 (0x98c), region = 40 }
  0x32   : > { %1096 = dma.done.wait (%p954_p1), [#allocation6], 5120  }
  0x33   : > { %1098 = vsyncadd (%p954_p1), [#allocation6], 4294962176  ;;  %s238_s21 = sand.u32 1, %s1109_s27   ;;  %s241_s22 = sld [smem:[#allocation4 + %s1189_s29]] }
  0x34   : > { %s1239_s23 = smul.u32 3, %s238_s21  ;;  %p1381_p13 = scmp.ne.s32.totalorder %s1189_s29, 0 }
  0x36   : > { %s240_s8 = scalar_lea.vmem [#allocation8], %s1239_s23 }
  0x38   : > { %249 = sbr.rel (%p1381_p13) target bundleno = 63 (0x3f), region = 48 }
  0x39   : > { %p242_p11 = scmp.lt.s32.totalorder %s241_s22, 47 }
  0x3b   : > { %s1388_s22 = smov (!%p242_p11, %s241_s22), 47 }
  0x3c   : > { %s244_s30 = scalar_lea.vmem %s1372_s1, %s1388_s22 }
  0x3d   : > { %v250_v0 = vld [vmem:[%s1373_s2] sm:$0x1]  ;;  %vm251_vm0 = vcmask 253952  }
  0x3e   : > { %252 = vst.msk [vmem:[#allocation2] sm:$0x1] %vm251_vm0, %v250_v0 }
  0x3f PF: > { %v280_v2 = vld [vmem:[#allocation5 + $0x120] sm:$0xff]  ;;  %v279_v3 = vld [vmem:[#allocation5 + $0x118] sm:$0xff]  ;;  %s1123_s14 = smov 32   ;;  %v277_v5 = vld [vmem:[#allocation5 + $0xf0] sm:$0xff]  ;;  %v1124_v7 = vmov 0.0   ;;  %vm263_vm1 = vcmask 261120   ;;  %v283_v22 = vlaneseq }
  0x40   : > { %313 = vmatprep.subr.mxu0 %v280_v2  ;;  %v278_v4 = vld [vmem:[#allocation5 + $0xf8] sm:$0xff]  ;;  %v276_v6 = vld [vmem:[#allocation5 + $0xd0] sm:$0xff]  ;;  %361 = vmatprep.mubr.f32.mxu0 %v1124_v7  ;;  %v275_v8 = vld [vmem:[#allocation5 + $0xc8] sm:$0xff]  ;;  %vm293_vm2 = vcmask 523264   ;;  %vm369_vm3 = vcmask 910080   ;;  %vm380_vm4 = vcmask 122880  }
  0x41   : > { %314 = vmatpush1.msra.mxu0 %v279_v3  ;;  %898 = vmatprep.subr.mxu1 %v1124_v7  ;;  %v274_v9 = vld [vmem:[#allocation5 + $0xa8] sm:$0xff]  ;;  %v273_v10 = vld [vmem:[#allocation5 + $0xa0] sm:$0xff]  ;;  %v271_v12 = vld [vmem:[#allocation5 + $0x78] sm:$0xff]  ;;  %v1267_v23 = vshrl.u32 %v283_v22, 7  ;;  %s1125_s19 = smov 64   ;;  %vm1126_vm5 = vmmov 0  }
  0x42   : > { %315 = vmatprep.subr.mxu0 %v278_v4  ;;  %v272_v11 = vld [vmem:[#allocation5 + $0x80] sm:$0xff]  ;;  %v270_v13 = vld [vmem:[#allocation5 + $0x58] sm:$0xff]  ;;  %v269_v14 = vld [vmem:[#allocation5 + $0x50] sm:$0xff]  ;;  %902 = vmatprep.mubr.msk.f32.mxu1 %vm1126_vm5, %v1124_v7  ;;  %vm391_vm6 = vcmask 130048   ;;  %s1127_s13 = smov 96   ;;  %vm741_vm7 = vcmask 253952  }
  0x43   : > { %316 = vmatpush1.msra.mxu0 %v277_v5  ;;  %v268_v15 = vld [vmem:[#allocation5 + $0x30] sm:$0xff]  ;;  %v267_v16 = vld [vmem:[#allocation5 + $0x28] sm:$0xff]  ;;  %v265_v18 = vld [vmem:[#allocation5] sm:$0xff]  ;;  %v285_v24 = vsub.s32 0, %v1267_v23  ;;  %v289_v25 = vsub.s32 1, %v1267_v23  ;;  %vm727_vm8 = vcmask 385024  }
  0x44   : > { %317 = vmatprep.subr.mxu0 %v276_v6  ;;  %v266_v17 = vld [vmem:[#allocation5 + $0x8] sm:$0xff]  ;;  %v254_v19 = vld [vmem:[%s244_s30] sm:$0x1]  ;;  %v467_v46 = vld [vmem:[#allocation5 + $0x90] sm:$0xff]  ;;  %vm743_vm9 = vcmask 392192   ;;  %s939_s16 = smul.u32 48, %s1189_s29 }
  0x45   : > { %v870_v1 = vld [vmem:[#allocation2] ss:$0 sm:$0xff]  ;;  %318 = vmatpush1.msra.mxu0 %v275_v8  ;;  %v387_v41 = vld [vmem:[%s1374_s3 + $0x8] sm:$0xff]  ;;  %v543_v56 = vld [vmem:[#allocation5 + $0x10] sm:$0xff]  ;;  %s795_s17 = sshll.u32 %s240_s8, 4  ;;  %vm777_vm10 = vcmp.lt.s32.totalorder %v283_v22, 384  ;;  %s796_s17 = int_to_ptr.vmem [resolvable:$true] %s795_s17 }
  0x46   : > { %260 = vrot.lane.b32.xlu0 %v870_v1, %s1123_s14  ;;  %319 = vmatprep.subr.mxu0 %v274_v9  ;;  %v281_v26 = vld [vmem:[%s1376_s5] sm:$0x3]  ;;  %v466_v48 = vld [vmem:[#allocation5 + $0x68] sm:$0xff]  ;;  %v547_v61 = vld [vmem:[%s1376_s5 + $0x2] sm:$0x1]  ;;  %s793_s20 = scalar_lea.hbm %s1377_s6, %s939_s16  ;;  %s781_s22 = scalar_lea.sflag [#allocation7], %s238_s21 }
  0x47   : > { %320 = vmatpush1.msra.mxu0 %v273_v10  ;;  %v286_v27 = vrot.slane %v281_v26, %v285_v24  ;;  %v290_v28 = vrot.slane %v281_v26, %v289_v25  ;;  %v386_v42 = vld [vmem:[%s1374_s3] sm:$0xff]  ;;  %899 = vmatpush3.msra.mxu1 %v387_v41  ;;  %v546_v51 = vld [vmem:[#allocation5 + $0x88] sm:$0xff]  ;;  %s1051_s24 = scalar_lea.vmem %s796_s17, 48  ;;  %s1129_s29 = smov [#allocation8]  }
  0x48   : > { %321 = vmatprep.subr.mxu0 %v272_v11  ;;  %900 = vmatprep.subr.mxu1 %v1124_v7  ;;  %v465_v49 = vld [vmem:[#allocation5 + $0x40] sm:$0xff]  ;;  %v464_v50 = vld [vmem:[#allocation5 + $0x18] sm:$0xff]  ;;  %p1052_p0 = scmp.ne.s32.totalorder %s796_s17, %s1051_s24  ;;  %s1055_s25 = sshll.u32 %s1129_s29, 4  ;;  %s1056_s25 = int_to_ptr.vmem [resolvable:$false] %s1055_s25 }
  0x49   : > { %322 = vmatpush1.msra.mxu0 %v271_v12  ;;  %901 = vmatpush3.msra.mxu1 %v386_v42  ;;  %v545_v54 = vld [vmem:[#allocation5 + $0x60] sm:$0xff]  ;;  %v544_v55 = vld [vmem:[#allocation5 + $0x38] sm:$0xff]  ;;  %v649_v12 = vld [vmem:[#allocation5 + $0x70] sm:$0xff]  ;;  %s1057_s30 = scalar_lea.vmem %s1056_s25, 96  ;;  %p1058_p3 = scmp.lt.s32.totalorder %s796_s17, %s1056_s25 }
  0x4a   : > { %323 = vmatprep.subr.mxu0 %v270_v13  ;;  %905 = vmatprep.subr.mxu1 %v1124_v7  ;;  %v650_v11 = vld [vmem:[#allocation5 + $0x98] sm:$0xff]  ;;  %v648_v13 = vld [vmem:[#allocation5 + $0x48] sm:$0xff]  ;;  %p1053_p1 = pnand %p1052_p0, %p1206_p10  ;;  %p1059_p4 = scmp.lt.s32.totalorder %s1057_s30, %s1051_s24 }
  0x4b   : > { %324 = vmatpush1.msra.mxu0 %v269_v14  ;;  %v647_v14 = vld [vmem:[#allocation5 + $0x20] sm:$0xff] }
  0x4c   : > { %325 = vmatprep.subr.mxu0 %v268_v15  ;;  %p1054_p2 = pneg %p1053_p1  ;;  %p1060_p5 = por %p1059_p4, %p1058_p3 }
  0x4d   : > { %326 = vmatpush1.msra.mxu0 %v267_v16 }
  0x4e   : > { %327 = vmatprep.subr.mxu0 %v266_v17  ;;  %p1061_p6 = pnand %p1060_p5, %p1054_p2 }
  0x4f   : > { %328 = vmatpush1.msra.mxu0 %v265_v18 }
  0x50   : > { %927 = vmatprep.subr.mxu0 %v1124_v7 }
  0xb8   : > { %v1262_v20 = vpop.permute.xlu0 %260 }
  0xb9   : > { %v264_v21 = vsel %vm263_vm1, %v254_v19, %v1262_v20 }
  0xba   : > { %871 = vmatmul.mubr.msk.f32.vlgmr.msra.gmra.mxu0 %vm293_vm2, %v264_v21 }
  0xbb   : > { %935 = vmatprep.mubr.msk.f32.mxu0 %vm1126_vm5, %v1124_v7  ;;  %928 = vmatpush3.msra.mxu0 %v650_v11 }
  0xbc   : > { %929 = vmatprep.subr.mxu0 %v1124_v7 }
  0xbd   : > { %930 = vmatpush3.msra.mxu0 %v649_v12 }
  0xbe   : > { %931 = vmatprep.subr.mxu0 %v1124_v7 }
  0xbf   : > { %932 = vmatpush3.msra.mxu0 %v648_v13 }
  0xc0   : > { %933 = vmatprep.subr.mxu0 %v1124_v7 }
  0xc1   : > { %934 = vmatpush3.msra.mxu0 %v647_v14 }
 0x17a   : > { %v363_v29 = vpop.f32.mrf.mxu0 }
 0x17b   : > { %v1274_v31 = vadd.f32 %v363_v29, %v286_v27 }
 0x17c   : > { %v365_v30 = vpop.f32.mrf.mxu0 }
 0x17d   : > { %v1276_v32 = vadd.f32 %v365_v30, %v290_v28 }
 0x17f   : > { %v368_v33 = vadd.f32 %v1276_v32, %v1274_v31 }
 0x181   : > { %v370_v34 = vsel %vm369_vm3, %v368_v33, -inf }
 0x182   : > { %371 = vmax.xlane.f32.xlu0 %v370_v34  ;;  %v1128_v34 = vmov 1966171168  }
 0x20b   : > { %v372_v35 = vpop.xlane.xlu0 %371 }
 0x20c   : > { %v373_v36 = vsub.f32 %v368_v33, %v372_v35  ;;  %v753_v35 = vunpack.c.l.s4 %v1128_v34 }
 0x20e   : > { %v374_v37 = vmul.f32 1.442695, %v373_v36 }
 0x210   : > { %999 = vpow2.f32 %v374_v37  ;;  %v754_v37 = vunpack.c.0.s8 %v753_v35 }
 0x21d   : > { %v1000_v38 = vpop.eup %999 }
 0x21e   : > { %377 = vrot.lane.b32.xlu1 %v1000_v38, %s1123_s14 }
 0x290   : > { %v378_v39 = vpop.permute.xlu1 %377 }
 0x291   : > { %v381_v40 = vsel %vm380_vm4, %v378_v39, 0.0 }
 0x292   : > { %382 = vadd.xlane.f32.xlu1 %v381_v40  ;;  %v757_v40 = vsub.s32 %v754_v37, %v1267_v23 }
 0x2a3   : > { %629 = vrot.lane.b32.xlu1 %v1274_v31, %s1125_s19 }
 0x31b   : > { %v383_v43 = vpop.xlane.xlu1 %382 }
 0x31c   : > { %1001 = vrcp.f32 %v383_v43 }
 0x31f   : > { %v630_v6 = vpop.permute.xlu1 %629 }
 0x329   : > { %v1002_v44 = vpop.eup %1001 }
 0x32a   : > { %v385_v45 = vmul.f32 %v1002_v44, %v1000_v38 }
 0x32c   : > { %389 = vrot.lane.b32.xlu0 %v385_v45, %s1123_s14 }
 0x39e   : > { %v1296_v47 = vpop.permute.xlu0 %389 }
 0x39f   : > { %903 = vmatmul.mubr.msk.f32.vlgmr.msra.gmra.mxu1 %vm391_vm6, %v1296_v47  ;;  %v747_v41 = vsel %vm391_vm6, %v1296_v47, 0.0 }
 0x3a0   : > { %906 = vmatpush3.msra.mxu1 %v467_v46  ;;  %913 = vmatprep.mubr.msk.f32.mxu1 %vm1126_vm5, %v1124_v7  ;;  %v765_v45 = vrot.slane %v747_v41, %v757_v40 }
 0x3a1   : > { %907 = vmatprep.subr.mxu1 %v1124_v7 }
 0x3a2   : > { %908 = vmatpush3.msra.mxu1 %v466_v48 }
 0x3a3   : > { %909 = vmatprep.subr.mxu1 %v1124_v7 }
 0x3a4   : > { %910 = vmatpush3.msra.mxu1 %v465_v49 }
 0x3a5   : > { %911 = vmatprep.subr.mxu1 %v1124_v7 }
 0x3a6   : > { %912 = vmatpush3.msra.mxu1 %v464_v50 }
 0x3a7   : > { %916 = vmatprep.subr.mxu1 %v1124_v7 }
 0x45f   : > { %v460_v52 = vpop.f32.mrf.mxu1 }
 0x460   : > { %914 = vmatmul.mubr.msk.f32.vlgmr.msra.gmra.mxu1 %vm263_vm1, %v460_v52 }
 0x461   : > { %v904_v53 = vpop.f32.mrf.mxu1  ;;  %917 = vmatpush3.msra.mxu1 %v546_v51  ;;  %924 = vmatprep.mubr.msk.f32.mxu1 %vm1126_vm5, %v1124_v7 }
 0x462   : > { %918 = vmatprep.subr.mxu1 %v1124_v7 }
 0x463   : > { %919 = vmatpush3.msra.mxu1 %v545_v54 }
 0x464   : > { %920 = vmatprep.subr.mxu1 %v1124_v7 }
 0x465   : > { %921 = vmatpush3.msra.mxu1 %v544_v55 }
 0x466   : > { %922 = vmatprep.subr.mxu1 %v1124_v7  ;;  %v651_v7 = vld [vmem:[%s1376_s5 + $0x4] sm:$0x1] }
 0x467   : > { %923 = vmatpush3.msra.mxu1 %v543_v56 }
 0x520   : > { %v537_v57 = vpop.f32.mrf.mxu1 }
 0x521   : > { %v541_v58 = vadd.f32 %v537_v57, %v1276_v32 }
 0x522   : > { %v915_v59 = vpop.f32.mrf.mxu1 }
 0x523   : > { %v542_v60 = vmax.f32 %v541_v58, 0.0 }
 0x525   : > { %925 = vmatmul.mubr.msk.f32.vlgmr.msra.gmra.mxu1 %vm263_vm1, %v542_v60 }
 0x5e5   : > { %v617_v62 = vpop.f32.mrf.mxu1 }
 0x5e6   : > { %v618_v63 = vadd.f32 %v617_v62, %v547_v61 }
 0x5e7   : > { %v926_v0 = vpop.f32.mrf.mxu1 }
 0x5e8   : > { %v621_v1 = vadd.f32 %v618_v63, %v1274_v31 }
 0x5ea   : > { %v875_v2 = vmul.f32 -1.442695, %v621_v1 }
 0x5ec   : > { %1003 = vpow2.f32 %v875_v2 }
 0x5f9   : > { %v1004_v3 = vpop.eup %1003 }
 0x5fa   : > { %v625_v4 = vadd.f32 1.0, %v1004_v3 }
 0x5fc   : > { %1005 = vrcp.f32 %v625_v4 }
 0x609   : > { %v1006_v5 = vpop.eup %1005 }
 0x60a   : > { %v632_v8 = vmul.f32 %v1006_v5, %v630_v6  ;;  %v639_v16 = vsub.f32 1.0, %v1006_v5  ;;  %v645_v18 = vmul.f32 %v1006_v5, %v1262_v20 }
 0x60c   : > { %634 = vrot.lane.b32.xlu0 %v632_v8, %s1125_s19 }
 0x67e   : > { %v635_v9 = vpop.permute.xlu0 %634 }
 0x67f   : > { %v637_v10 = vadd.f32 %v635_v9, %v618_v63 }
 0x681   : > { %1007 = vtanh.f32 %v637_v10 }
 0x68e   : > { %v1008_v15 = vpop.eup %1007 }
 0x68f   : > { %641 = vrot.lane.b32.xlu1 %v1008_v15, %s1127_s13 }
 0x701   : > { %v642_v17 = vpop.permute.xlu1 %641 }
 0x702   : > { %v644_v19 = vmul.f32 %v642_v17, %v639_v16 }
 0x704   : > { %v646_v21 = vadd.f32 %v645_v18, %v644_v19 }
 0x706   : > { %653 = vrot.lane.b32.xlu0 %v646_v21, %s1127_s13 }
 0x778   : > { %v654_v24 = vpop.permute.xlu0 %653 }
 0x779   : > { %742 = vst.msk [vmem:[#allocation2] sm:$0x1] %vm741_vm7, %v654_v24  ;;  %936 = vmatmul.mubr.msk.f32.vlgmr.msra.gmra.mxu0 %vm263_vm1, %v654_v24  ;;  %v745_v42 = vsel %vm263_vm1, %v654_v24, 0.0 }
 0x839   : > { %v723_v25 = vpop.f32.mrf.mxu0 }
 0x83a   : > { %v724_v26 = vadd.f32 %v723_v25, %v651_v7 }
 0x83b   : > { %v937_v27 = vpop.f32.mrf.mxu0 }
 0x83c   : > { %v728_v28 = vsel %vm727_vm8, %v724_v26, -inf }
 0x83d   : > { %729 = vmax.xlane.f32.xlu1 %v728_v28 }
 0x8c6   : > { %v730_v29 = vpop.xlane.xlu1 %729 }
 0x8c7   : > { %v731_v20 = vsub.f32 %v724_v26, %v730_v29 }
 0x8c9   : > { %v732_v30 = vmul.f32 1.442695, %v731_v20 }
 0x8cb   : > { %1009 = vpow2.f32 %v732_v30 }
 0x8d8   : > { %v1010_v31 = vpop.eup %1009 }
 0x8d9   : > { %v734_v32 = vsel %vm727_vm8, %v1010_v31, 0.0 }
 0x8da   : > { %735 = vadd.xlane.f32.xlu0 %v734_v32 }
 0x963   : > { %v736_v33 = vpop.xlane.xlu0 %735 }
 0x964   : > { %1011 = vlog2.f32 %v736_v33 }
 0x971   : > { %v1012_v36 = vpop.eup %1011 }
 0x972   : > { %v738_v38 = vmul.f32 0.6931472, %v1012_v36 }
 0x974   : > { %v739_v39 = vsub.f32 %v731_v20, %v738_v38 }
 0x976   : > { %v744_v43 = vsel %vm743_vm9, %v739_v39, 0.0 }
 0x977   : > { %v751_v44 = vcombine.low %v744_v43, %v745_v42 }
 0x979   : > { %v758_v46 = vrot.slane %v751_v44, %v757_v40 }
 0x97b   : > { %v766_v48 = vcombine.low %v758_v46, %v765_v45 }
 0x97d   : > { %v773_v49 = vrot.slane %v766_v48, %v757_v40 }
 0x97f   : > { %779 = vst.msk [vmem:[%s240_s8] sm:$0x7] %vm777_vm10, %v773_v49 }
 0x980   : > { %1064 = shalt.err (!%p1061_p6)
}
 0x981   : > { %s1065_s9 = scalar_lea.hbm %s793_s20, 48  ;;  %s1069_s8 = scalar_lea.hbm %s1377_s6, 192 }
 0x982   : > { %p1066_p7 = scmp.ne.s32.totalorder %s793_s20, %s1065_s9  ;;  %p1070_p12 = scmp.lt.s32.totalorder %s793_s20, %s1377_s6 }
 0x983   : > { %p1071_p11 = scmp.lt.s32.totalorder %s1069_s8, %s1065_s9 }
 0x984   : > { %p1067_p8 = pnand %p1066_p7, %p1206_p10 }
 0x985   : > { %p1072_p13 = por %p1071_p11, %p1070_p12 }
 0x986   : > { %p1068_p9 = pneg %p1067_p8 }
 0x988   : > { %p1073_p0 = pnand %p1072_p13, %p1068_p9 }
 0x98a   : > { %1076 = shalt.err (!%p1073_p0)
}
 0x98b   : > { %944 = dma.vmem_to_hbm [thread:$0]  (%p1206_p10), %s796_s17, 48, %s793_s20, %s781_s22  }
 0x98c PF: > { %p956_p1 = scmp.ge.s32.totalorder %s1117_s28, 2  ;;  %s807_s15 = sand.u32 1, %s1105_s26  }
 0x98d   : > { %p1382_p2 = scmp.ne.s32.totalorder %s1379_s12, 0  ;;  %s808_s16 = scalar_lea.sflag [#allocation7], %s807_s15 }
 0x98f   : > { %p951_p3 = pnand %p956_p1, %p1382_p2 }
 0x991   : > { %p952_p4 = pneg %p951_p3 }
 0x993   : > { %1100 = dma.done.wait (%p952_p4), %s808_s16, 48  }
 0x994   : > { %1102 = vsyncadd (%p952_p4), %s808_s16, 4294967248  ;;  %p23_p5 = scmp.ge.s32.totalorder %s1193_s7, 6   ;;  %s1383_s26 = smov %s1109_s27 }
 0x995   : > { %s1384_s27 = smov %s1113_s0  ;;  %s1385_s0 = smov %s1204_s10 }
 0x996   : > { %s1386_s28 = smov %s1193_s7  ;;  %25 = sbr.rel (!%p23_p5) target bundleno = 19 (0x13), region = 84 }
 0x99b   :  { %813 = vsyncpa [#allocation6], 1 }
 0x99c   :  { %815 = vsyncpa [#allocation6 + $0x1], 1 }
 0x99d   :  { %816 = vsyncpa [#allocation7], 1 }
 0x99e   :  { %818 = vsyncpa [#allocation7 + $0x1], 1 }

</bundles_post_ra>
